<compile_context>
chip_gen: v7x
topology: tpu7x:2x2x1
jax: 0.10.0
libtpu: 0.0.40
codegen_flags: <defaults>
</compile_context>

<pallas_src>
import math

import jax
import jax.numpy as jnp
from jax.experimental import pallas as pl
from jax.experimental.pallas import tpu as pltpu


def _gru_cell_kernel(
    x_ref,      # [TB, 2E]  bf16   full (unsplit) inputs
    h_ref,      # [TB, H]   f32    state
    w_in_ref,   # [2E, 4H]  bf16   packed input-side weights (gate path folded in)
    w_hc_ref,   # [H, 3H]   bf16   packed [Wrh|Wuh|Wch]
    b_ref,      # [1, 4H]   f32    packed [br|bu|bc|bg_folded]
    out_ref,    # [TB, H]   f32    new_h
):
    f32 = jnp.float32
    bf16 = jnp.bfloat16
    H = h_ref.shape[-1]

    x = x_ref[...]                        # bf16
    h = h_ref[...]                        # f32 (kept exact for u*h / r*h terms)
    b = b_ref[...]                        # f32
    w_hc = w_hc_ref[...]                  # bf16

    # One wide matmul gives all input-side pre-activations:
    #   [r_x | u_x | c_x | gate]  ->  [TB, 4H]
    xin = jnp.dot(x, w_in_ref[...], preferred_element_type=f32)
    # One matmul for both state-side gate pre-activations: [r_h | u_h] -> [TB, 2H]
    hin = jnp.dot(h.astype(bf16), w_hc[:, : 2 * H], preferred_element_type=f32)

    # r, u from a single fused [TB, 2H] slab (one add, one EUP pass).
    ru = jax.nn.sigmoid(xin[:, : 2 * H] + hin + b[:, : 2 * H])
    r = ru[:, :H]
    u = ru[:, H : 2 * H]

    # candidate = tanh(x @ Wcx + (r*state) @ Wch + bc)
    r_state = (r * h).astype(bf16)
    c = jnp.tanh(
        xin[:, 2 * H : 3 * H]
        + jnp.dot(r_state, w_hc[:, 2 * H :], preferred_element_type=f32)
        + b[:, 2 * H : 3 * H]
    )

    # new_gate = semantic_emb @ Wg1 + neighbor_emb @ Wg2 + bg, with the two
    # linear layers folded into the main matmul (no activation in between).
    gate = xin[:, 3 * H :] + b[:, 3 * H :]

    # new_h = u * state + (1 - u) * c * new_gate
    new_h = u * h + (1.0 - u) * c * gate
    out_ref[...] = new_h.astype(out_ref.dtype)


def pack_params(params, embedding_size, hidden_size):
    """One-time packing of per-block weights into the kernel's fused slabs."""
    E, H = embedding_size, hidden_size
    f32 = jnp.float32
    bf16 = jnp.bfloat16

    # Fold layer1/layer2 -> new_gate (exact in f32; no nonlinearity in between).
    wg_x = params["w1"] @ params["wg1"]          # [E, H]
    wg_nb = params["w2"] @ params["wg2"]         # [E, H]
    bg_folded = params["b1"] @ params["wg1"] + params["b2"] @ params["wg2"] + params["bg"]

    z = jnp.zeros((E, 3 * H), f32)
    top = jnp.concatenate([params["wrx"], params["wux"], params["wcx"], wg_x], axis=1)
    bot = jnp.concatenate([z, wg_nb], axis=1)
    w_in = jnp.concatenate([top, bot], axis=0).astype(bf16)                 # [2E, 4H]
    w_hc = jnp.concatenate(
        [params["wrh"], params["wuh"], params["wch"]], axis=1
    ).astype(bf16)                                                          # [H, 3H]
    bias = jnp.concatenate(
        [params["br"], params["bu"], params["bc"], bg_folded], axis=1
    ).astype(f32)                                                           # [1, 4H]
    return {"w_in": w_in, "w_hc": w_hc, "bias": bias}


def modified_gru_cell(inputs, state, packed, *, max_batch_tile=256):
    """inputs: [B, input_size], state: [B, H] -> (new_h, new_h)."""
    B, input_size = inputs.shape
    H = state.shape[1]
    E = input_size // 2
    assert input_size == 2 * E, "input_size must be even"

    # Pad batch to a multiple of 8 (full vreg sublanes), then tile it.
    pB = max(8, -(-B // 8) * 8)
    TB = min(pB, max_batch_tile)
    pB = -(-pB // TB) * TB
    if pB != B:
        inputs_p = jnp.pad(inputs, ((0, pB - B), (0, 0)))
        state_p = jnp.pad(state, ((0, pB - B), (0, 0)))
    else:
        inputs_p, state_p = inputs, state

    x_bf16 = inputs_p.astype(jnp.bfloat16)   # bf16 activations: half the DMA bytes

    grid = (pB // TB,)
    new_h = pl.pallas_call(
        _gru_cell_kernel,
        out_shape=jax.ShapeDtypeStruct((pB, H), jnp.float32),
        grid_spec=pltpu.PrefetchScalarGridSpec(
            num_scalar_prefetch=0,
            grid=grid,
            in_specs=[
                pl.BlockSpec((TB, 2 * E), lambda i: (i, 0)),     # inputs (unsplit)
                pl.BlockSpec((TB, H), lambda i: (i, 0)),         # state
                pl.BlockSpec((2 * E, 4 * H), lambda i: (0, 0)),  # W_in (resident)
                pl.BlockSpec((H, 3 * H), lambda i: (0, 0)),      # W_hc (resident)
                pl.BlockSpec((1, 4 * H), lambda i: (0, 0)),      # bias (resident)
            ],
            out_specs=pl.BlockSpec((TB, H), lambda i: (i, 0)),
        ),
        compiler_params=pltpu.CompilerParams(
            # Batch tiles are independent -> shard across both TCs on v7x.
            dimension_semantics=("parallel",),
        ),
    )(x_bf16, state_p, packed["w_in"], packed["w_hc"], packed["bias"])

    new_h = new_h[:B]
    return new_h, new_h


def init_params(key, input_size, hidden_size):
    """Deterministic init mirroring the nn.Linear shapes of ModifiedGRUCell.

    PyTorch nn.Linear stores weight as [out, in]; here each Linear over a
    concatenated input is split into per-operand blocks and pre-transposed to
    [in, out] so the kernel does x @ W.
    """
    E = int(input_size / 2)
    H = hidden_size

    def linear(key, fan_in, fan_out):
        bound = 1.0 / math.sqrt(fan_in)
        kw, kb = jax.random.split(key)
        w = jax.random.uniform(kw, (fan_in, fan_out), jnp.float32, -bound, bound)
        b = jax.random.uniform(kb, (1, fan_out), jnp.float32, -bound, bound)
        return w, b

    keys = jax.random.split(key, 7)
    w_r, br = linear(keys[0], E + H, H)
    w_u, bu = linear(keys[1], E + H, H)
    w_c, bc = linear(keys[2], E + H, H)
    w1, b1 = linear(keys[3], E, H)
    w2, b2 = linear(keys[4], E, H)
    w_g, bg = linear(keys[5], 2 * H, H)
    # new_r_gate / relu_activation exist in __init__ but are unused in forward.
    _w_nr, _b_nr = linear(keys[6], 2 * H, H)

    return {
        "wrx": w_r[:E], "wrh": w_r[E:], "br": br,
        "wux": w_u[:E], "wuh": w_u[E:], "bu": bu,
        "wcx": w_c[:E], "wch": w_c[E:], "bc": bc,
        "w1": w1, "b1": b1,
        "w2": w2, "b2": b2,
        "wg1": w_g[:H], "wg2": w_g[H:], "bg": bg,
    }


def _reference(inputs, state, params):
    """Pure-JAX f32 reference replicating the PyTorch forward exactly."""
    E = inputs.shape[1] // 2
    x = inputs[:, :E]
    nb = inputs[:, inputs.shape[1] - E:]
    r = jax.nn.sigmoid(x @ params["wrx"] + state @ params["wrh"] + params["br"])
    u = jax.nn.sigmoid(x @ params["wux"] + state @ params["wuh"] + params["bu"])
    c = jnp.tanh(x @ params["wcx"] + (r * state) @ params["wch"] + params["bc"])
    sem = x @ params["w1"] + params["b1"]
    nbe = nb @ params["w2"] + params["b2"]
    g = sem @ params["wg1"] + nbe @ params["wg2"] + params["bg"]
    return u * state + (1.0 - u) * c * g


if __name__ == "__main__":
    key = jax.random.PRNGKey(0)
    k_in, k_h, k_p = jax.random.split(key, 3)

    batch = 4
    input_size = 64     # embedding_size = 32
    hidden_size = 32

    inputs = jax.random.normal(k_in, (batch, input_size), jnp.float32)
    state = jax.random.normal(k_h, (batch, hidden_size), jnp.float32)
    params = init_params(k_p, input_size, hidden_size)
    packed = pack_params(params, input_size // 2, hidden_size)

    new_h, new_h_copy = modified_gru_cell(inputs, state, packed)
    jax.block_until_ready(new_h)

    ref = _reference(inputs, state, params)
    # Tolerance loosened vs pure f32 because matmul operands run through the
    # MXU in bf16 (f32 accumulation).
    assert new_h.shape == (batch, hidden_size)
    assert jnp.allclose(new_h, ref, atol=5e-2, rtol=5e-2), "mismatch vs reference"

    print("KERNEL_OK")
</pallas_src>

<mosaic_0001>
module attributes {stable_mosaic.version = 11 : i64} {
  func.func @_gru_cell_kernel(%arg0: i32, %arg1: memref<8x64xbf16, #tpu.memory_space<vmem>>, %arg2: memref<8x32xf32, #tpu.memory_space<vmem>>, %arg3: memref<64x128xbf16, #tpu.memory_space<vmem>>, %arg4: memref<32x96xbf16, #tpu.memory_space<vmem>>, %arg5: memref<1x128xf32, #tpu.memory_space<vmem>>, %arg6: memref<8x32xf32, #tpu.memory_space<vmem>>) attributes {dimension_semantics = [#tpu.dimension_semantics<parallel>], iteration_bounds = array<i64: 1>, scalar_prefetch = 0 : i64, scratch_operands = 0 : i64, tpu.core_type = #tpu.core_type<tc>, window_params = [{transform_indices = @transform_0, window_bounds = array<i64: 8, 64>}, {transform_indices = @transform_1, window_bounds = array<i64: 8, 32>}, {pipeline_mode = #tpu.pipeline_mode<synchronous>, transform_indices = @transform_2, window_bounds = array<i64: 64, 128>}, {pipeline_mode = #tpu.pipeline_mode<synchronous>, transform_indices = @transform_3, window_bounds = array<i64: 32, 96>}, {pipeline_mode = #tpu.pipeline_mode<synchronous>, transform_indices = @transform_4, window_bounds = array<i64: 1, 128>}, {transform_indices = @transform_5, window_bounds = array<i64: 8, 32>}]} {
    %c0 = arith.constant 0 : index
    %c0_0 = arith.constant 0 : index
    %0 = vector.load %arg1[%c0, %c0_0] : memref<8x64xbf16, #tpu.memory_space<vmem>>, vector<8x64xbf16>
    %c0_1 = arith.constant 0 : index
    %c0_2 = arith.constant 0 : index
    %1 = vector.load %arg2[%c0_1, %c0_2] : memref<8x32xf32, #tpu.memory_space<vmem>>, vector<8x32xf32>
    %c0_3 = arith.constant 0 : index
    %c0_4 = arith.constant 0 : index
    %2 = vector.load %arg5[%c0_3, %c0_4] : memref<1x128xf32, #tpu.memory_space<vmem>>, vector<1x128xf32>
    %c0_5 = arith.constant 0 : index
    %c0_6 = arith.constant 0 : index
    %3 = vector.load %arg4[%c0_5, %c0_6] : memref<32x96xbf16, #tpu.memory_space<vmem>>, vector<32x96xbf16>
    %c0_7 = arith.constant 0 : index
    %c0_8 = arith.constant 0 : index
    %4 = vector.load %arg3[%c0_7, %c0_8] : memref<64x128xbf16, #tpu.memory_space<vmem>>, vector<64x128xbf16>
    %cst = arith.constant dense<0.000000e+00> : vector<8x128xf32>
    %5 = tpu.matmul %0, %4, %cst {dimension_numbers = #tpu.dot_dimension_numbers<[1], [0], [0], [1], [0, 0, 1, 1], [], []>} : vector<8x64xbf16>, vector<64x128xbf16>, vector<8x128xf32> -> vector<8x128xf32>
    %6 = arith.truncf %1 : vector<8x32xf32> to vector<8x32xbf16>
    %7 = vector.extract_strided_slice %3 {offsets = [0, 0], sizes = [32, 64], strides = [1, 1]} : vector<32x96xbf16> to vector<32x64xbf16>
    %cst_9 = arith.constant dense<0.000000e+00> : vector<8x64xf32>
    %8 = tpu.matmul %6, %7, %cst_9 {dimension_numbers = #tpu.dot_dimension_numbers<[1], [0], [0], [1], [0, 0, 1, 1], [], []>} : vector<8x32xbf16>, vector<32x64xbf16>, vector<8x64xf32> -> vector<8x64xf32>
    %9 = vector.extract_strided_slice %5 {offsets = [0, 0], sizes = [8, 64], strides = [1, 1]} : vector<8x128xf32> to vector<8x64xf32>
    %10 = arith.addf %9, %8 : vector<8x64xf32>
    %11 = vector.extract_strided_slice %2 {offsets = [0, 0], sizes = [1, 64], strides = [1, 1]} : vector<1x128xf32> to vector<1x64xf32>
    %12 = vector.broadcast %11 : vector<1x64xf32> to vector<8x64xf32>
    %13 = arith.addf %10, %12 : vector<8x64xf32>
    %14 = arith.negf %13 : vector<8x64xf32>
    %15 = math.exp %14 : vector<8x64xf32>
    %cst_10 = arith.constant 1.000000e+00 : f32
    %16 = vector.broadcast %cst_10 : f32 to vector<8x64xf32>
    %17 = arith.addf %16, %15 : vector<8x64xf32>
    %18 = arith.divf %16, %17 : vector<8x64xf32>
    %19 = vector.extract_strided_slice %18 {offsets = [0, 0], sizes = [8, 32], strides = [1, 1]} : vector<8x64xf32> to vector<8x32xf32>
    %20 = vector.extract_strided_slice %18 {offsets = [0, 32], sizes = [8, 32], strides = [1, 1]} : vector<8x64xf32> to vector<8x32xf32>
    %21 = arith.mulf %19, %1 : vector<8x32xf32>
    %22 = arith.truncf %21 : vector<8x32xf32> to vector<8x32xbf16>
    %23 = vector.extract_strided_slice %5 {offsets = [0, 64], sizes = [8, 32], strides = [1, 1]} : vector<8x128xf32> to vector<8x32xf32>
    %24 = vector.extract_strided_slice %3 {offsets = [0, 64], sizes = [32, 32], strides = [1, 1]} : vector<32x96xbf16> to vector<32x32xbf16>
    %cst_11 = arith.constant dense<0.000000e+00> : vector<8x32xf32>
    %25 = tpu.matmul %22, %24, %cst_11 {dimension_numbers = #tpu.dot_dimension_numbers<[1], [0], [0], [1], [0, 0, 1, 1], [], []>} : vector<8x32xbf16>, vector<32x32xbf16>, vector<8x32xf32> -> vector<8x32xf32>
    %26 = arith.addf %23, %25 : vector<8x32xf32>
    %27 = vector.extract_strided_slice %2 {offsets = [0, 64], sizes = [1, 32], strides = [1, 1]} : vector<1x128xf32> to vector<1x32xf32>
    %28 = vector.broadcast %27 : vector<1x32xf32> to vector<8x32xf32>
    %29 = arith.addf %26, %28 : vector<8x32xf32>
    %30 = math.tanh %29 : vector<8x32xf32>
    %31 = vector.extract_strided_slice %5 {offsets = [0, 96], sizes = [8, 32], strides = [1, 1]} : vector<8x128xf32> to vector<8x32xf32>
    %32 = vector.extract_strided_slice %2 {offsets = [0, 96], sizes = [1, 32], strides = [1, 1]} : vector<1x128xf32> to vector<1x32xf32>
    %33 = vector.broadcast %32 : vector<1x32xf32> to vector<8x32xf32>
    %34 = arith.addf %31, %33 : vector<8x32xf32>
    %35 = arith.mulf %20, %1 : vector<8x32xf32>
    %cst_12 = arith.constant 1.000000e+00 : f32
    %36 = vector.broadcast %cst_12 : f32 to vector<8x32xf32>
    %37 = arith.subf %36, %20 : vector<8x32xf32>
    %38 = arith.mulf %37, %30 : vector<8x32xf32>
    %39 = arith.mulf %38, %34 : vector<8x32xf32>
    %40 = arith.addf %35, %39 : vector<8x32xf32>
    %c0_13 = arith.constant 0 : index
    %c0_14 = arith.constant 0 : index
    %41 = vector.load %arg6[%c0_13, %c0_14] : memref<8x32xf32, #tpu.memory_space<vmem>>, vector<8x32xf32>
    tpu.vector_store %arg6[%c0_13, %c0_14], %40 {strides = array<i32>} : memref<8x32xf32, #tpu.memory_space<vmem>>, vector<8x32xf32>,
    return
  }
  func.func @transform_0(%arg0: i32) -> (i32, i32) {
    %c0_i32 = arith.constant 0 : i32
    %c0_i32_0 = arith.constant 0 : i32
    return %arg0, %c0_i32 : i32, i32
  }
  func.func @transform_1(%arg0: i32) -> (i32, i32) {
    %c0_i32 = arith.constant 0 : i32
    %c0_i32_0 = arith.constant 0 : i32
    return %arg0, %c0_i32 : i32, i32
  }
  func.func @transform_2(%arg0: i32) -> (i32, i32) {
    %c0_i32 = arith.constant 0 : i32
    %c0_i32_0 = arith.constant 0 : i32
    %c0_i32_1 = arith.constant 0 : i32
    return %c0_i32, %c0_i32_0 : i32, i32
  }
  func.func @transform_3(%arg0: i32) -> (i32, i32) {
    %c0_i32 = arith.constant 0 : i32
    %c0_i32_0 = arith.constant 0 : i32
    %c0_i32_1 = arith.constant 0 : i32
    return %c0_i32, %c0_i32_0 : i32, i32
  }
  func.func @transform_4(%arg0: i32) -> (i32, i32) {
    %c0_i32 = arith.constant 0 : i32
    %c0_i32_0 = arith.constant 0 : i32
    %c0_i32_1 = arith.constant 0 : i32
    return %c0_i32, %c0_i32_0 : i32, i32
  }
  func.func @transform_5(%arg0: i32) -> (i32, i32) {
    %c0_i32 = arith.constant 0 : i32
    %c0_i32_0 = arith.constant 0 : i32
    return %arg0, %c0_i32 : i32, i32
  }
}

</mosaic_0001>

<bundles_post_ra>
// kernel: tpu_custom_call.1
= control target key start
LH: loop header
LB: loop body
LE: loop exit
PB: predicated region body
PF: predicated region fallthrough
CT: control target
= control target key end

     0   :  { %10 = vsyncpa [#allocation3], 0  ;;  %s634_s0 = inlined_call_operand.hbm [shape: bf16[8,64], index: 0, kind: input, shape index: {}]   ;;  %s635_s1 = inlined_call_operand.hbm [shape: f32[8,32], index: 1, kind: input, shape index: {}]   ;;  %s636_s2 = inlined_call_operand.hbm [shape: bf16[64,128], index: 2, kind: input, shape index: {}]   ;;  %s637_s3 = inlined_call_operand.hbm [shape: bf16[32,96], index: 3, kind: input, shape index: {}]   ;;  %s638_s4 = inlined_call_operand.vmem [shape: f32[1,128], index: 4, kind: input, shape index: {}]   ;;  %s639_s5 = inlined_call_operand.hbm [shape: f32[8,32], index: 5, kind: output, shape index: {}]  }
   0x1   :  { %11 = vsyncpa [#allocation6], 0 }
   0x2   :  { %12 = vsyncpa [#allocation9], 0 }
   0x3   :  { %13 = vsyncpa [#allocation4], 0  ;;  %s516_s18 = smov [#allocation5]   ;;  %s517_s20 = smov [#allocation2]  }
   0x4   :  { %s30_s19 = sshll.u32 %s516_s18, 4  ;;  %s20_s21 = sshll.u32 %s517_s20, 4  ;;  %s31_s19 = int_to_ptr.vmem [resolvable:$true] %s30_s19  ;;  %s21_s21 = int_to_ptr.vmem [resolvable:$true] %s20_s21 }
   0x5   :  { %s398_s24 = scalar_lea.hbm %s635_s1, 128 }
   0x6   :  { %p399_p0 = scmp.ne.s32.totalorder %s635_s1, %s398_s24  ;;  %p402_p1 = scmp.lt.u32.totalorder %s398_s24, %s635_s1 }
   0x8   :  { %p404_p2 = pnand %p402_p1, %p399_p0 }
   0xa   :  { %407 = shalt.err (!%p404_p2)
}
   0xb   :  { %s408_s29 = scalar_lea.vmem %s31_s19, 128  ;;  %p413_p4 = scmp.lt.s32.totalorder %s31_s19, %s31_s19 }
   0xc   :  { %p409_p3 = scmp.ne.s32.totalorder %s31_s19, %s408_s29  ;;  %p414_p5 = scmp.lt.s32.totalorder %s408_s29, %s408_s29 }
   0xe   :  { %p415_p6 = por %p414_p5, %p413_p4 }
  0x10   :  { %p416_p7 = pnand %p415_p6, %p409_p3 }
  0x12   :  { %419 = shalt.err (!%p416_p7)
}
  0x13   :  { %33 = dma.hbm_to_vmem [thread:$0]  %s635_s1, 128, %s31_s19, [#allocation6]  }
  0x14   :  { %s420_s9 = scalar_lea.hbm %s634_s0, 64 }
  0x15   :  { %p421_p8 = scmp.ne.s32.totalorder %s634_s0, %s420_s9  ;;  %p424_p9 = scmp.lt.u32.totalorder %s420_s9, %s634_s0 }
  0x17   :  { %p426_p10 = pnand %p424_p9, %p421_p8 }
  0x19   :  { %429 = shalt.err (!%p426_p10)
}
  0x1a   :  { %s430_s14 = scalar_lea.vmem %s21_s21, 64  ;;  %p435_p12 = scmp.lt.s32.totalorder %s21_s21, %s21_s21 }
  0x1b   :  { %p431_p11 = scmp.ne.s32.totalorder %s21_s21, %s430_s14  ;;  %p436_p13 = scmp.lt.s32.totalorder %s430_s14, %s430_s14 }
  0x1d   :  { %p437_p0 = por %p436_p13, %p435_p12 }
  0x1f   :  { %p438_p1 = pnand %p437_p0, %p431_p11 }
  0x21   :  { %441 = shalt.err (!%p438_p1)
}
  0x22   :  { %23 = dma.hbm_to_vmem [thread:$0]  %s634_s0, 64, %s21_s21, [#allocation3]  }
  0x23   :  { %s518_s16 = smov [#allocation7]   ;;  %s442_s20 = scalar_lea.hbm %s636_s2, 512 }
  0x24   :  { %s39_s17 = sshll.u32 %s518_s16, 4  ;;  %p443_p2 = scmp.ne.s32.totalorder %s636_s2, %s442_s20  ;;  %s40_s17 = int_to_ptr.vmem [resolvable:$true] %s39_s17 }
  0x25   :  { %p446_p3 = scmp.lt.u32.totalorder %s442_s20, %s636_s2 }
  0x27   :  { %p448_p4 = pnand %p446_p3, %p443_p2 }
  0x29   :  { %451 = shalt.err (!%p448_p4)
}
  0x2a   :  { %s452_s26 = scalar_lea.vmem %s40_s17, 512  ;;  %p457_p6 = scmp.lt.s32.totalorder %s40_s17, %s40_s17 }
  0x2b   :  { %p453_p5 = scmp.ne.s32.totalorder %s40_s17, %s452_s26  ;;  %p458_p7 = scmp.lt.s32.totalorder %s452_s26, %s452_s26 }
  0x2d   :  { %p459_p8 = por %p458_p7, %p457_p6 }
  0x2f   :  { %p460_p9 = pnand %p459_p8, %p453_p5 }
  0x31   :  { %463 = shalt.err (!%p460_p9)
}
  0x32   :  { %s519_s0 = smov 64   ;;  %s520_s21 = smov 4  }
  0x33   :  { %45 = dma.hbm_to_vmem [thread:$0]  %s636_s2, 512, %s40_s17, [#allocation6], %s519_s0, %s519_s0, %s520_s21  }
  0x34   :  { %s521_s29 = smov [#allocation8]   ;;  %s464_s8 = scalar_lea.hbm %s637_s3, 256 }
  0x35   :  { %s51_s30 = sshll.u32 %s521_s29, 4  ;;  %p465_p10 = scmp.ne.s32.totalorder %s637_s3, %s464_s8  ;;  %s52_s30 = int_to_ptr.vmem [resolvable:$true] %s51_s30 }
  0x36   :  { %p468_p11 = scmp.lt.u32.totalorder %s464_s8, %s637_s3 }
  0x38   :  { %p470_p12 = pnand %p468_p11, %p465_p10 }
  0x3a   :  { %473 = shalt.err (!%p470_p12)
}
  0x3b   :  { %s474_s13 = scalar_lea.vmem %s52_s30, 256  ;;  %p479_p0 = scmp.lt.s32.totalorder %s52_s30, %s52_s30 }
  0x3c   :  { %p475_p13 = scmp.ne.s32.totalorder %s52_s30, %s474_s13  ;;  %p480_p1 = scmp.lt.s32.totalorder %s474_s13, %s474_s13 }
  0x3e   :  { %p481_p2 = por %p480_p1, %p479_p0 }
  0x40   :  { %p482_p3 = pnand %p481_p2, %p475_p13 }
  0x42   :  { %485 = shalt.err (!%p482_p3)
}
  0x43   :  { %57 = dma.hbm_to_vmem [thread:$0]  %s637_s3, 256, %s52_s30, [#allocation9], %s519_s0, %s519_s0, %s520_s21  }
  0x44   :  { %508 = dma.done.wait [#allocation3], 64  }
  0x45   :  { %509 = vsyncadd [#allocation3], 4294967232 }
  0x46   :  { %510 = dma.done.wait [#allocation6], 640  }
  0x47   :  { %511 = vsyncadd [#allocation6], 4294966656 }
  0x48   :  { %512 = dma.done.wait [#allocation9], 256  }
  0x49   :  { %513 = vsyncadd [#allocation9], 4294967040  ;;  %v522_v0 = vmov 0.0   ;;  %vm523_vm0 = vmmov 0   ;;  %v386_v1 = vld [vmem:[#allocation7] sm:$0xff]   ;;  %v387_v2 = vld [vmem:[#allocation7 + $0x8] sm:$0xff]  }
  0x4a   :  { %347 = vmatprep.subr.bf16.mxu0 %v522_v0  ;;  %359 = vmatprep.subr.bf16.mxu1 %v522_v0  ;;  %v388_v3 = vld [vmem:[#allocation8] sm:$0xff]   ;;  %v390_v4 = vld [vmem:[#allocation8 + $0x8] sm:$0xff]   ;;  %v389_v5 = vld [vmem:[#allocation7 + $0x10] sm:$0xff]   ;;  %vm169_vm1 = vcmask 261120   ;;  %s524_s3 = smov 32   ;;  %vm112_vm2 = vcmask 523264  }
  0x4b   :  { %363 = vmatprep.mubr.msk.bf16.mxu1 %vm523_vm0, %v522_v0  ;;  %355 = vmatprep.mubr.msk.bf16.mxu0 %vm523_vm0, %v522_v0  ;;  %v74_v6 = vld [vmem:[#allocation5] sm:$0xff]  ;;  %v73_v9 = vld [vmem:[#allocation2] sm:$0xf]  ;;  %s526_s16 = smov [#allocation10]  }
  0x4c   :  { %348 = vmatpush3.bf16.msra.mxu0 %v386_v1  ;;  %360 = vmatpush3.bf16.msra.mxu1 %v388_v3  ;;  %v156_v7 = vpack.c.bf16 %v74_v6, %v74_v6  ;;  %v391_v8 = vld [vmem:[#allocation7 + $0x18] sm:$0xff]   ;;  %v333_v19 = vld [vmem:[%s638_s4] ss:$0 sm:$0xff]  ;;  %s525_s4 = smov 96   ;;  %s314_s17 = sshll.u32 %s526_s16, 4  ;;  %s315_s17 = int_to_ptr.vmem [resolvable:$true] %s314_s17 }
  0x4d   :  { %349 = vmatprep.subr.bf16.mxu0 %v522_v0  ;;  %229 = vrot.lane.b32.xlu0 %v388_v3, %s519_s0  ;;  %s486_s18 = scalar_lea.vmem %s315_s17, 128  ;;  %p491_p5 = scmp.lt.s32.totalorder %s315_s17, %s315_s17 }
  0x4e   :  { %361 = vmatprep.subr.bf16.mxu1 %v522_v0  ;;  %p487_p4 = scmp.ne.s32.totalorder %s315_s17, %s486_s18  ;;  %p492_p6 = scmp.lt.s32.totalorder %s486_s18, %s486_s18 }
  0x50   :  { %350 = vmatpush3.bf16.msra.mxu0 %v387_v2  ;;  %362 = vmatpush3.bf16.msra.mxu1 %v390_v4  ;;  %p493_p7 = por %p492_p6, %p491_p5 }
  0x51   :  { %351 = vmatprep.subr.bf16.mxu0 %v522_v0  ;;  %231 = vrot.lane.b32.xlu0 %v390_v4, %s519_s0 }
  0x52   :  { %367 = vmatprep.subr.bf16.mxu1 %v522_v0  ;;  %p494_p8 = pnand %p493_p7, %p487_p4 }
  0x53   :  { %364 = vmatmul.mubr.msk.bf16.vlgmr.msra.gmra.mrb[0].mxu1 %vm169_vm1, %v156_v7 }
  0x54   :  { %352 = vmatpush3.bf16.msra.mxu0 %v389_v5  ;;  %371 = vmatprep.mubr.msk.bf16.mxu1 %vm523_vm0, %v522_v0 }
  0x55   :  { %353 = vmatprep.subr.bf16.mxu0 %v522_v0  ;;  %287 = vrot.lane.b32.xlu0 %v74_v6, %s524_s3 }
  0x58   :  { %354 = vmatpush3.bf16.msra.mxu0 %v391_v8 }
  0x5b   :  { %356 = vmatmul.mubr.msk.bf16.vlgmr.msra.gmra.mrb[0].mxu0 %vm112_vm2, %v73_v9 }
  0xbf   :  { %v230_v10 = vpop.permute.xlu0 %229 }
  0xc0   :  { %368 = vmatpush3.bf16.msra.mxu1 %v230_v10 }
  0xc1   :  { %369 = vmatprep.subr.bf16.mxu1 %v522_v0 }
  0xc3   :  { %v232_v11 = vpop.permute.xlu0 %231 }
  0xc4   :  { %370 = vmatpush3.bf16.msra.mxu1 %v232_v11 }
  0xc7   :  { %v288_v40 = vpop.permute.xlu0 %287 }
 0x126   :  { %v207_v12 = vpop.f32.mrb[0].mxu1 }
 0x127   :  { %v365_v13 = vpop.f32.mrb[1].mxu1 }
 0x128   :  { %v210_v14 = vpop.f32.mrb[2].mxu1 }
 0x129   :  { %v366_v15 = vpop.f32.mrb[3].mxu1 }
 0x12e   :  { %v150_v16 = vpop.f32.mrb[0].mxu0 }
 0x12f   :  { %v213_v17 = vadd.f32 %v207_v12, %v150_v16  ;;  %v357_v18 = vpop.f32.mrb[1].mxu0  ;;  %v285_v37 = vadd.f32 %v333_v19, %v150_v16 }
 0x130   :  { %v153_v20 = vpop.f32.mrb[2].mxu0 }
 0x131   :  { %v220_v21 = vadd.f32 %v333_v19, %v213_v17  ;;  %v358_v22 = vpop.f32.mrb[3].mxu0 }
 0x133   :  { %v334_v23 = vmul.f32 -1.442695, %v220_v21 }
 0x135   :  { %392 = vpow2.f32 %v334_v23 }
 0x13f   :  { %v393_v24 = vpop.eup %392 }
 0x140   :  { %v224_v25 = vadd.f32 1.0, %v393_v24 }
 0x142   :  { %394 = vrcp.f32 %v224_v25 }
 0x14c   :  { %v395_v26 = vpop.eup %394 }
 0x14d   :  { %v227_v27 = vmul.f32 %v395_v26, %v74_v6  ;;  %v291_v39 = vsub.f32 1.0, %v395_v26  ;;  %v290_v43 = vmul.f32 %v395_v26, %v288_v40 }
 0x14f   :  { %v228_v28 = vpack.c.bf16 %v227_v27, %v227_v27 }
 0x151   :  { %372 = vmatmul.mubr.msk.bf16.vlgmr.msra.gmra.mrb[4].mxu1 %vm169_vm1, %v228_v28 }
 0x224   :  { %v272_v29 = vpop.f32.mrb[4].mxu1 }
 0x225   :  { %279 = vrot.lane.b32.xlu1 %v272_v29, %s519_s0  ;;  %v373_v30 = vpop.f32.mrb[5].mxu1 }
 0x226   :  { %v275_v31 = vpop.f32.mrb[6].mxu1 }
 0x227   :  { %v374_v32 = vpop.f32.mrb[7].mxu1 }
 0x297   :  { %v280_v33 = vpop.permute.xlu1 %279 }
 0x298   :  { %v282_v34 = vadd.f32 %v280_v33, %v150_v16 }
 0x29a   :  { %v283_v35 = vadd.f32 %v333_v19, %v282_v34 }
 0x29c   :  { %396 = vtanh.f32 %v283_v35 }
 0x2a6   :  { %v397_v36 = vpop.eup %396 }
 0x2a7   :  { %293 = vrot.lane.b32.xlu1 %v397_v36, %s525_s4 }
 0x2ab   :  { %298 = vrot.lane.b32.xlu1 %v285_v37, %s519_s0 }
 0x319   :  { %v294_v38 = vpop.permute.xlu1 %293 }
 0x31a   :  { %v296_v41 = vmul.f32 %v294_v38, %v291_v39 }
 0x31d   :  { %v299_v42 = vpop.permute.xlu1 %298 }
 0x31e   :  { %v301_v44 = vmul.f32 %v299_v42, %v296_v41 }
 0x320   :  { %v302_v45 = vadd.f32 %v301_v44, %v290_v43 }
 0x322   :  { %304 = vrot.lane.b32.xlu0 %v302_v45, %s525_s4 }
 0x394   :  { %v305_v46 = vpop.permute.xlu0 %304 }
 0x395   :  { %307 = vst.msk [vmem:[#allocation10] sm:$0xff] %vm169_vm1, %v305_v46 }
 0x396   :  { %497 = shalt.err (!%p494_p8)
}
 0x397   :  { %s498_s22 = scalar_lea.hbm %s639_s5, 128 }
 0x398   :  { %p499_p9 = scmp.ne.s32.totalorder %s639_s5, %s498_s22  ;;  %p502_p10 = scmp.lt.u32.totalorder %s498_s22, %s639_s5 }
 0x39a   :  { %p504_p11 = pnand %p502_p10, %p499_p9 }
 0x39c   :  { %507 = shalt.err (!%p504_p11)
}
 0x39d   :  { %317 = dma.vmem_to_hbm [thread:$0]  %s315_s17, 128, %s639_s5, [#allocation4]  }
 0x39e   :  { %514 = dma.done.wait [#allocation4], 128  }
 0x39f   :  { %515 = vsyncadd [#allocation4], 4294967168 }
 0x3a0   :  { %321 = vsyncpa [#allocation3], 1 }
 0x3a1   :  { %322 = vsyncpa [#allocation6], 1 }
 0x3a2   :  { %323 = vsyncpa [#allocation9], 1 }
 0x3a3   :  { %324 = vsyncpa [#allocation4], 1 }

</bundles_post_ra>
